<compile_context>
chip_gen: v6e
topology: v6e:2x2x1
jax: 0.10.0
libtpu: 0.0.40
codegen_flags: <defaults>
</compile_context>

<pallas_src>
import functools

import jax
import jax.numpy as jnp
from jax.experimental import pallas as pl
from jax.experimental.pallas import tpu as pltpu


def ppo_policy_kernel(x_ref, w1_ref, b1_ref, w2_ref, b2_ref, out_ref):
    # fc1: x @ W1 + b1, ReLU (MXU matmul, f32 accumulation). Casting the x tile
    # to the weight dtype is a no-op for f32 and gives single-pass bf16 MXU when
    # the weights were pre-cast (use_bf16_matmul) — no extra HBM traffic.
    x = x_ref[...].astype(w1_ref.dtype)
    h = jnp.dot(x, w1_ref[...], preferred_element_type=jnp.float32)
    h = h + b1_ref[...]                         # (TB, H) + (1, H) broadcast
    h = jnp.maximum(h, 0.0)
    # fc2: h @ W2 + b2
    logits = jnp.dot(h.astype(w2_ref.dtype), w2_ref[...],
                     preferred_element_type=jnp.float32)
    logits = logits + b2_ref[...]               # (TB, O) + (1, O) broadcast
    # Numerically stable softmax along the last dim. The reciprocal goes to the
    # EUP slot (approx=True); one Newton step restores ~f32 accuracy so the
    # 1e-5 parity check against the pure-JAX reference still holds.
    m = jnp.max(logits, axis=-1, keepdims=True)
    e = jnp.exp(logits - m)
    denom = jnp.sum(e, axis=-1, keepdims=True)
    r = pl.reciprocal(denom, approx=True)
    r = r * (2.0 - denom * r)                   # Newton refinement (2 VPU ops)
    out_ref[...] = (e * r).astype(out_ref.dtype)


def _round_up(n, m):
    return ((n + m - 1) // m) * m


def _choose_batch_tile(batch, block_b, min_steps=2):
    """Multiple-of-8 batch tile: as large as block_b allows (amortizes the
    ~0.35 us per-grid-step overhead) but capped so the grid keeps >= min_steps
    steps when the batch is big enough (v7x megacore split + double-buffering)."""
    b8 = _round_up(batch, 8)
    tb = min(_round_up(block_b, 8), b8)
    if b8 >= min_steps * 8:
        tb = min(tb, _round_up(pl.cdiv(b8, min_steps), 8))
    return max(tb, 8)


@functools.partial(jax.jit, static_argnames=("block_b", "use_bf16_matmul"))
def ppo_policy_forward(x, w1, b1, w2, b2, *, block_b=2048, use_bf16_matmul=False):
    B, D_in = x.shape
    H = w1.shape[1]
    O = w2.shape[1]

    # bf16 path: only the tiny (~25 KiB) weights are cast here. x is NOT cast
    # in the wrapper — keep/produce x in bf16 upstream to halve its HBM stream;
    # the in-kernel cast handles mixed dtypes either way.
    if use_bf16_matmul:
        w1 = w1.astype(jnp.bfloat16)
        w2 = w2.astype(jnp.bfloat16)

    tb = _choose_batch_tile(B, block_b)
    grid = (pl.cdiv(B, tb),)
    # No jnp.pad: the ragged last block (if any) is handled by Pallas — partial
    # reads; out-of-bounds rows are computed on unspecified VMEM contents and
    # their writes are discarded. Rows are independent, so valid output is exact.

    x_item = jnp.dtype(x.dtype).itemsize
    w_item = jnp.dtype(w1.dtype).itemsize
    cost = pl.CostEstimate(
        flops=2 * B * (D_in * H + H * O),
        transcendentals=B * O,                          # exp in softmax
        bytes_accessed=(B * D_in * x_item               # x
                        + (D_in * H + H * O) * w_item   # weights
                        + (H + O) * 4                   # biases (f32)
                        + B * O * 4),                   # probs out (f32)
    )

    out = pl.pallas_call(
        ppo_policy_kernel,
        out_shape=jax.ShapeDtypeStruct((B, O), jnp.float32),
        grid=grid,
        in_specs=[
            pl.BlockSpec((tb, D_in), lambda i: (i, 0)),   # x: streamed per tile
            pl.BlockSpec((D_in, H), lambda i: (0, 0)),    # W1: VMEM-resident
            pl.BlockSpec((1, H), lambda i: (0, 0)),       # b1: VMEM-resident
            pl.BlockSpec((H, O), lambda i: (0, 0)),       # W2: VMEM-resident
            pl.BlockSpec((1, O), lambda i: (0, 0)),       # b2: VMEM-resident
        ],
        out_specs=pl.BlockSpec((tb, O), lambda i: (i, 0)),
        compiler_params=pltpu.CompilerParams(
            dimension_semantics=("parallel",),            # megacore on v7x
        ),
        cost_estimate=cost,
    )(x, w1, b1, w2, b2)

    return out


def init_params(key, input_dim, hidden_dim, output_dim):
    # Deterministic init mimicking torch.nn.Linear default (U[-1/sqrt(fan_in), 1/sqrt(fan_in)]).
    k1, k2, k3, k4 = jax.random.split(key, 4)
    s1 = 1.0 / jnp.sqrt(input_dim)
    s2 = 1.0 / jnp.sqrt(hidden_dim)
    w1 = jax.random.uniform(k1, (input_dim, hidden_dim), jnp.float32, -s1, s1)
    b1 = jax.random.uniform(k2, (1, hidden_dim), jnp.float32, -s1, s1)
    w2 = jax.random.uniform(k3, (hidden_dim, output_dim), jnp.float32, -s2, s2)
    b2 = jax.random.uniform(k4, (1, output_dim), jnp.float32, -s2, s2)
    return w1, b1, w2, b2


if __name__ == "__main__":
    # NOTE: at B=8 this head is pure launch overhead; the grid/pipelining pays
    # off for realistic PPO rollout batches (B in the thousands).
    B, INPUT_DIM, HIDDEN, OUTPUT_DIM = 8, 32, 128, 16

    key = jax.random.PRNGKey(0)
    kx, kp = jax.random.split(key)
    x = jax.random.normal(kx, (B, INPUT_DIM), jnp.float32)
    w1, b1, w2, b2 = init_params(kp, INPUT_DIM, HIDDEN, OUTPUT_DIM)

    out = jax.block_until_ready(ppo_policy_forward(x, w1, b1, w2, b2))

    # Pure-JAX reference check of the same forward pass.
    h_ref = jnp.maximum(x @ w1 + b1, 0.0)
    ref = jax.nn.softmax(h_ref @ w2 + b2, axis=-1)
    assert out.shape == (B, OUTPUT_DIM)
    assert jnp.allclose(out, ref, atol=1e-5, rtol=1e-5)
    assert jnp.allclose(jnp.sum(out, axis=-1), 1.0, atol=1e-5)

    # Ragged case: B not a multiple of 8 and not a multiple of the tile —
    # exercises the pad-free partial last block (no jnp.pad copy of x).
    B2 = 300
    x2 = jax.random.normal(jax.random.PRNGKey(1), (B2, INPUT_DIM), jnp.float32)
    out2 = jax.block_until_ready(ppo_policy_forward(x2, w1, b1, w2, b2))
    ref2 = jax.nn.softmax(jnp.maximum(x2 @ w1 + b1, 0.0) @ w2 + b2, axis=-1)
    assert out2.shape == (B2, OUTPUT_DIM)
    assert jnp.allclose(out2, ref2, atol=1e-5, rtol=1e-5)

    print("KERNEL_OK")
</pallas_src>

<mosaic_0001>
module attributes {stable_mosaic.version = 11 : i64} {
  func.func @ppo_policy_kernel(%arg0: i32, %arg1: memref<8x32xf32, #tpu.memory_space<vmem>>, %arg2: memref<32x128xf32, #tpu.memory_space<vmem>>, %arg3: memref<1x128xf32, #tpu.memory_space<vmem>>, %arg4: memref<128x16xf32, #tpu.memory_space<vmem>>, %arg5: memref<1x16xf32, #tpu.memory_space<vmem>>, %arg6: memref<8x16xf32, #tpu.memory_space<vmem>>) attributes {dimension_semantics = [#tpu.dimension_semantics<parallel>], iteration_bounds = array<i64: 1>, scalar_prefetch = 0 : i64, scratch_operands = 0 : i64, tpu.core_type = #tpu.core_type<tc>, window_params = [{transform_indices = @transform_0, window_bounds = array<i64: 8, 32>}, {pipeline_mode = #tpu.pipeline_mode<synchronous>, transform_indices = @transform_1, window_bounds = array<i64: 32, 128>}, {pipeline_mode = #tpu.pipeline_mode<synchronous>, transform_indices = @transform_2, window_bounds = array<i64: 1, 128>}, {pipeline_mode = #tpu.pipeline_mode<synchronous>, transform_indices = @transform_3, window_bounds = array<i64: 128, 16>}, {pipeline_mode = #tpu.pipeline_mode<synchronous>, transform_indices = @transform_4, window_bounds = array<i64: 1, 16>}, {transform_indices = @transform_5, window_bounds = array<i64: 8, 16>}]} {
    %c0 = arith.constant 0 : index
    %c0_0 = arith.constant 0 : index
    %0 = vector.load %arg1[%c0, %c0_0] : memref<8x32xf32, #tpu.memory_space<vmem>>, vector<8x32xf32>
    %c0_1 = arith.constant 0 : index
    %c0_2 = arith.constant 0 : index
    %1 = vector.load %arg2[%c0_1, %c0_2] : memref<32x128xf32, #tpu.memory_space<vmem>>, vector<32x128xf32>
    %cst = arith.constant dense<0.000000e+00> : vector<8x128xf32>
    %2 = tpu.matmul %0, %1, %cst {dimension_numbers = #tpu.dot_dimension_numbers<[1], [0], [0], [1], [0, 0, 1, 1], [], []>} : vector<8x32xf32>, vector<32x128xf32>, vector<8x128xf32> -> vector<8x128xf32>
    %c0_3 = arith.constant 0 : index
    %c0_4 = arith.constant 0 : index
    %3 = vector.load %arg3[%c0_3, %c0_4] : memref<1x128xf32, #tpu.memory_space<vmem>>, vector<1x128xf32>
    %4 = vector.broadcast %3 : vector<1x128xf32> to vector<8x128xf32>
    %5 = arith.addf %2, %4 : vector<8x128xf32>
    %cst_5 = arith.constant 0.000000e+00 : f32
    %6 = vector.broadcast %cst_5 : f32 to vector<8x128xf32>
    %7 = arith.maximumf %5, %6 : vector<8x128xf32>
    %c0_6 = arith.constant 0 : index
    %c0_7 = arith.constant 0 : index
    %8 = vector.load %arg4[%c0_6, %c0_7] : memref<128x16xf32, #tpu.memory_space<vmem>>, vector<128x16xf32>
    %cst_8 = arith.constant dense<0.000000e+00> : vector<8x16xf32>
    %9 = tpu.matmul %7, %8, %cst_8 {dimension_numbers = #tpu.dot_dimension_numbers<[1], [0], [0], [1], [0, 0, 1, 1], [], []>} : vector<8x128xf32>, vector<128x16xf32>, vector<8x16xf32> -> vector<8x16xf32>
    %c0_9 = arith.constant 0 : index
    %c0_10 = arith.constant 0 : index
    %10 = vector.load %arg5[%c0_9, %c0_10] : memref<1x16xf32, #tpu.memory_space<vmem>>, vector<1x16xf32>
    %11 = vector.broadcast %10 : vector<1x16xf32> to vector<8x16xf32>
    %12 = arith.addf %9, %11 : vector<8x16xf32>
    %cst_11 = arith.constant dense<0xFF800000> : vector<8xf32>
    %13 = vector.multi_reduction <maximumf>, %12, %cst_11 [1] : vector<8x16xf32> to vector<8xf32>
    %14 = vector.shape_cast %13 : vector<8xf32> to vector<8x1xf32>
    %15 = vector.broadcast %14 : vector<8x1xf32> to vector<8x16xf32>
    %16 = arith.subf %12, %15 : vector<8x16xf32>
    %17 = math.exp %16 : vector<8x16xf32>
    %cst_12 = arith.constant dense<0.000000e+00> : vector<8xf32>
    %18 = vector.multi_reduction <add>, %17, %cst_12 [1] : vector<8x16xf32> to vector<8xf32>
    %19 = vector.shape_cast %18 : vector<8xf32> to vector<8x1xf32>
    %20 = tpu.reciprocal %19 {approx = true} : vector<8x1xf32> -> vector<8x1xf32>
    %21 = arith.mulf %19, %20 : vector<8x1xf32>
    %cst_13 = arith.constant 2.000000e+00 : f32
    %22 = vector.broadcast %cst_13 : f32 to vector<8x1xf32>
    %23 = arith.subf %22, %21 : vector<8x1xf32>
    %24 = arith.mulf %20, %23 : vector<8x1xf32>
    %25 = vector.broadcast %24 : vector<8x1xf32> to vector<8x16xf32>
    %26 = arith.mulf %17, %25 : vector<8x16xf32>
    %c0_14 = arith.constant 0 : index
    %c0_15 = arith.constant 0 : index
    %27 = vector.load %arg6[%c0_14, %c0_15] : memref<8x16xf32, #tpu.memory_space<vmem>>, vector<8x16xf32>
    tpu.vector_store %arg6[%c0_14, %c0_15], %26 {strides = array<i32>} : memref<8x16xf32, #tpu.memory_space<vmem>>, vector<8x16xf32>,
    return
  }
  func.func @transform_0(%arg0: i32) -> (i32, i32) {
    %c0_i32 = arith.constant 0 : i32
    %c0_i32_0 = arith.constant 0 : i32
    return %arg0, %c0_i32 : i32, i32
  }
  func.func @transform_1(%arg0: i32) -> (i32, i32) {
    %c0_i32 = arith.constant 0 : i32
    %c0_i32_0 = arith.constant 0 : i32
    %c0_i32_1 = arith.constant 0 : i32
    return %c0_i32, %c0_i32_0 : i32, i32
  }
  func.func @transform_2(%arg0: i32) -> (i32, i32) {
    %c0_i32 = arith.constant 0 : i32
    %c0_i32_0 = arith.constant 0 : i32
    %c0_i32_1 = arith.constant 0 : i32
    return %c0_i32, %c0_i32_0 : i32, i32
  }
  func.func @transform_3(%arg0: i32) -> (i32, i32) {
    %c0_i32 = arith.constant 0 : i32
    %c0_i32_0 = arith.constant 0 : i32
    %c0_i32_1 = arith.constant 0 : i32
    return %c0_i32, %c0_i32_0 : i32, i32
  }
  func.func @transform_4(%arg0: i32) -> (i32, i32) {
    %c0_i32 = arith.constant 0 : i32
    %c0_i32_0 = arith.constant 0 : i32
    %c0_i32_1 = arith.constant 0 : i32
    return %c0_i32, %c0_i32_0 : i32, i32
  }
  func.func @transform_5(%arg0: i32) -> (i32, i32) {
    %c0_i32 = arith.constant 0 : i32
    %c0_i32_0 = arith.constant 0 : i32
    return %arg0, %c0_i32 : i32, i32
  }
}

</mosaic_0001>

<bundles_post_ra>
// kernel: ppo_policy_forward.1
= control target key start
LH: loop header
LB: loop body
LE: loop exit
PB: predicated region body
PF: predicated region fallthrough
CT: control target
= control target key end

     0   :  { %v331_v1 = vmov 0.0   ;;  %vm332_vm0 = vmmov 0   ;;  %vm33_vm1 = vcmask 261120   ;;  %s463_s0 = inlined_call_operand.vmem [shape: f32[8,32], index: 0, kind: input, shape index: {}]   ;;  %s464_s1 = inlined_call_operand.vmem [shape: f32[32,128], index: 1, kind: input, shape index: {}]   ;;  %s465_s2 = inlined_call_operand.vmem [shape: f32[1,128], index: 2, kind: input, shape index: {}]   ;;  %s466_s3 = inlined_call_operand.vmem [shape: f32[128,16], index: 3, kind: input, shape index: {}]   ;;  %s467_s4 = inlined_call_operand.vmem [shape: f32[1,16], index: 4, kind: input, shape index: {}]   ;;  %s468_s5 = inlined_call_operand.hbm [shape: f32[8,16], index: 5, kind: output, shape index: {}]  }
   0x1   :  { %v25_v0 = vld [vmem:[%s464_s1 + $0x18] sm:$0xff]  ;;  %256 = vmatprep.subr.mxu0 %v331_v1  ;;  %v24_v2 = vld [vmem:[%s464_s1 + $0x10] sm:$0xff]  ;;  %264 = vmatprep.mubr.msk.f32.mxu0 %vm332_vm0, %v331_v1  ;;  %v23_v5 = vld [vmem:[%s464_s1 + $0x8] sm:$0xff] }
   0x2   :  { %v123_v3 = vld [vmem:[%s466_s3 + $0x78] sm:$0xff]  ;;  %257 = vmatpush3.msra.mxu0 %v25_v0  ;;  %267 = vmatprep.subr.mxu1 %v331_v1  ;;  %v122_v4 = vld [vmem:[%s466_s3 + $0x70] sm:$0xff]  ;;  %v121_v6 = vld [vmem:[%s466_s3 + $0x68] sm:$0xff] }
   0x3   :  { %258 = vmatprep.subr.mxu0 %v331_v1  ;;  %268 = vmatpush3.msra.mxu1 %v123_v3  ;;  %v22_v7 = vld [vmem:[%s464_s1] sm:$0xff] }
   0x4   :  { %259 = vmatpush3.msra.mxu0 %v24_v2  ;;  %269 = vmatprep.subr.mxu1 %v331_v1  ;;  %v21_v8 = vld [vmem:[%s463_s0] sm:$0xff] }
   0x5   :  { %260 = vmatprep.subr.mxu0 %v331_v1  ;;  %270 = vmatpush3.msra.mxu1 %v122_v4  ;;  %v120_v9 = vld [vmem:[%s466_s3 + $0x60] sm:$0xff] }
   0x6   :  { %261 = vmatpush3.msra.mxu0 %v23_v5  ;;  %271 = vmatprep.subr.mxu1 %v331_v1 }
   0x7   :  { %10 = vsyncpa [#allocation3], 0  ;;  %262 = vmatprep.subr.mxu0 %v331_v1  ;;  %272 = vmatpush3.msra.mxu1 %v121_v6  ;;  %v119_v10 = vld [vmem:[%s466_s3 + $0x58] sm:$0xff]  ;;  %v118_v11 = vld [vmem:[%s466_s3 + $0x50] sm:$0xff]  ;;  %vm201_vm2 = vcmask 130048  }
   0x8   :  { %263 = vmatpush3.msra.mxu0 %v22_v7  ;;  %273 = vmatprep.subr.mxu1 %v331_v1  ;;  %v117_v12 = vld [vmem:[%s466_s3 + $0x48] sm:$0xff]  ;;  %v116_v13 = vld [vmem:[%s466_s3 + $0x40] sm:$0xff]  ;;  %v115_v14 = vld [vmem:[%s466_s3 + $0x38] sm:$0xff] }
   0x9   :  { %265 = vmatmul.mubr.msk.f32.vlgmr.msra.gmra.mxu0 %vm33_vm1, %v21_v8  ;;  %274 = vmatpush3.msra.mxu1 %v120_v9  ;;  %v114_v15 = vld [vmem:[%s466_s3 + $0x30] sm:$0xff]  ;;  %v113_v16 = vld [vmem:[%s466_s3 + $0x28] sm:$0xff]  ;;  %v112_v17 = vld [vmem:[%s466_s3 + $0x20] sm:$0xff] }
   0xa   :  { %275 = vmatprep.subr.mxu1 %v331_v1  ;;  %299 = vmatprep.mubr.msk.f32.mxu1 %vm332_vm0, %v331_v1  ;;  %v111_v18 = vld [vmem:[%s466_s3 + $0x18] sm:$0xff]  ;;  %v110_v19 = vld [vmem:[%s466_s3 + $0x10] sm:$0xff]  ;;  %v109_v20 = vld [vmem:[%s466_s3 + $0x8] sm:$0xff] }
   0xb   :  { %276 = vmatpush3.msra.mxu1 %v119_v10  ;;  %v108_v21 = vld [vmem:[%s466_s3] sm:$0xff] }
   0xc   :  { %277 = vmatprep.subr.mxu1 %v331_v1  ;;  %v231_v22 = vld [vmem:[%s465_s2] ss:$0 sm:$0xff]  ;;  %s333_s2 = smov [#allocation2]  }
   0xd   :  { %278 = vmatpush3.msra.mxu1 %v118_v11  ;;  %v233_v27 = vld [vmem:[%s467_s4] ss:$0 sm:$0xff]  ;;  %s223_s3 = sshll.u32 %s333_s2, 4  ;;  %s224_s3 = int_to_ptr.vmem [resolvable:$true] %s223_s3 }
   0xe   :  { %279 = vmatprep.subr.mxu1 %v331_v1  ;;  %s309_s4 = scalar_lea.vmem %s224_s3, 128  ;;  %p314_p1 = scmp.lt.s32.totalorder %s224_s3, %s224_s3 }
   0xf   :  { %280 = vmatpush3.msra.mxu1 %v117_v12  ;;  %p310_p0 = scmp.ne.s32.totalorder %s224_s3, %s309_s4  ;;  %p315_p2 = scmp.lt.s32.totalorder %s309_s4, %s309_s4 }
  0x10   :  { %281 = vmatprep.subr.mxu1 %v331_v1 }
  0x11   :  { %282 = vmatpush3.msra.mxu1 %v116_v13  ;;  %p316_p3 = por %p315_p2, %p314_p1 }
  0x12   :  { %283 = vmatprep.subr.mxu1 %v331_v1 }
  0x13   :  { %284 = vmatpush3.msra.mxu1 %v115_v14  ;;  %p317_p4 = pnand %p316_p3, %p310_p0 }
  0x14   :  { %285 = vmatprep.subr.mxu1 %v331_v1 }
  0x15   :  { %286 = vmatpush3.msra.mxu1 %v114_v15 }
  0x16   :  { %287 = vmatprep.subr.mxu1 %v331_v1 }
  0x17   :  { %288 = vmatpush3.msra.mxu1 %v113_v16 }
  0x18   :  { %289 = vmatprep.subr.mxu1 %v331_v1 }
  0x19   :  { %290 = vmatpush3.msra.mxu1 %v112_v17 }
  0x1a   :  { %291 = vmatprep.subr.mxu1 %v331_v1 }
  0x1b   :  { %292 = vmatpush3.msra.mxu1 %v111_v18 }
  0x1c   :  { %293 = vmatprep.subr.mxu1 %v331_v1 }
  0x1d   :  { %294 = vmatpush3.msra.mxu1 %v110_v19 }
  0x1e   :  { %295 = vmatprep.subr.mxu1 %v331_v1 }
  0x1f   :  { %296 = vmatpush3.msra.mxu1 %v109_v20 }
  0x20   :  { %297 = vmatprep.subr.mxu1 %v331_v1 }
  0x21   :  { %298 = vmatpush3.msra.mxu1 %v108_v21 }
  0xc9   :  { %v103_v23 = vpop.f32.mrf.mxu0 }
  0xca   :  { %v104_v24 = vadd.f32 %v231_v22, %v103_v23 }
  0xcb   :  { %v266_v25 = vpop.f32.mrf.mxu0 }
  0xcc   :  { %v107_v26 = vmax.f32 %v104_v24, 0.0 }
  0xce   :  { %300 = vmatmul.mubr.f32.vlgmr.msra.gmra.mxu1 %v107_v26 }
 0x18e   :  { %v197_v28 = vpop.f32.mrf.mxu1 }
 0x18f   :  { %v198_v29 = vadd.f32 %v233_v27, %v197_v28 }
 0x190   :  { %v301_v30 = vpop.f32.mrf.mxu1 }
 0x191   :  { %v202_v31 = vsel %vm201_vm2, %v198_v29, -inf }
 0x192   :  { %203 = vmax.xlane.f32.xlu0 %v202_v31 }
 0x21b   :  { %v204_v32 = vpop.xlane.xlu0 %203 }
 0x21c   :  { %v205_v33 = vsub.f32 %v198_v29, %v204_v32 }
 0x21e   :  { %v206_v34 = vmul.f32 1.442695, %v205_v33 }
 0x220   :  { %305 = vpow2.f32 %v206_v34 }
 0x22d   :  { %v306_v35 = vpop.eup %305 }
 0x22e   :  { %v208_v36 = vsel %vm201_vm2, %v306_v35, 0.0 }
 0x22f   :  { %209 = vadd.xlane.f32.xlu0 %v208_v36 }
 0x2b8   :  { %v210_v37 = vpop.xlane.xlu0 %209 }
 0x2b9   :  { %307 = vrcp.f32 %v210_v37 }
 0x2c6   :  { %v308_v38 = vpop.eup %307 }
 0x2c7   :  { %v212_v39 = vmul.f32 %v308_v38, %v210_v37 }
 0x2c9   :  { %v213_v40 = vsub.f32 2.0, %v212_v39 }
 0x2cb   :  { %v214_v41 = vmul.f32 %v308_v38, %v213_v40 }
 0x2cd   :  { %v215_v42 = vmul.f32 %v306_v35, %v214_v41 }
 0x2cf   :  { %216 = vst.msk [vmem:[#allocation2] sm:$0xff] %vm201_vm2, %v215_v42 }
 0x2d0   :  { %320 = shalt.err (!%p317_p4)
}
 0x2d1   :  { %226 = dma.vmem_to_hbm [thread:$0]  %s224_s3, 128, %s468_s5, [#allocation3]  }
 0x2d2   :  { %329 = dma.done.wait [#allocation3], 128  }
 0x2d3   :  { %330 = vsyncadd [#allocation3], 4294967168 }
 0x2d4   :  { %230 = vsyncpa [#allocation3], 1 }

</bundles_post_ra>
